<compile_context>
chip_gen: v7x
topology: tpu7x:2x2x1
jax: 0.10.0
libtpu: 0.0.40
codegen_flags: <defaults>
</compile_context>

<pallas_src>
import math
import jax
import jax.numpy as jnp
from jax.experimental import pallas as pl
from jax.experimental.pallas import tpu as pltpu


def _round_up(a, b):
    return ((a + b - 1) // b) * b


def _cdiv(a, b):
    return (a + b - 1) // b


# ---------------------------------------------------------------------------
# Kernels
# ---------------------------------------------------------------------------
def _ffn_kernel_f32_out(x_ref, w1_ref, b1_ref, w2_ref, b2_ref, o_ref):
    """f32 output: accumulate the second matmul directly into o_ref (no scratch)."""
    j = pl.program_id(1)

    @pl.when(j == 0)
    def _init():
        o_ref[...] = jnp.zeros_like(o_ref)

    # (TM, d_model) @ (d_model, TF) -> f32 (TM, TF) on the MXU.
    h = jnp.dot(x_ref[...], w1_ref[...], preferred_element_type=jnp.float32)
    # Bias + ReLU in f32 on the VPU; downcast fused into the operand of matmul 2.
    h = jnp.maximum(h + b1_ref[...].astype(jnp.float32), 0.0)
    # Dropout (inference / eval mode) == identity.
    o_ref[...] += jnp.dot(h.astype(w2_ref.dtype), w2_ref[...],
                          preferred_element_type=jnp.float32)

    @pl.when(j == pl.num_programs(1) - 1)
    def _finalize():
        o_ref[...] += b2_ref[...].astype(jnp.float32)


def _ffn_kernel_scratch(x_ref, w1_ref, b1_ref, w2_ref, b2_ref, o_ref, acc_ref):
    """Narrow output dtype (e.g. bf16): accumulate in f32 scratch, cast once."""
    j = pl.program_id(1)

    @pl.when(j == 0)
    def _init():
        acc_ref[...] = jnp.zeros_like(acc_ref)

    h = jnp.dot(x_ref[...], w1_ref[...], preferred_element_type=jnp.float32)
    h = jnp.maximum(h + b1_ref[...].astype(jnp.float32), 0.0)
    acc_ref[...] += jnp.dot(h.astype(w2_ref.dtype), w2_ref[...],
                            preferred_element_type=jnp.float32)

    @pl.when(j == pl.num_programs(1) - 1)
    def _finalize():
        o_ref[...] = (acc_ref[...] + b2_ref[...].astype(jnp.float32)).astype(o_ref.dtype)


# ---------------------------------------------------------------------------
# Wrapper
# ---------------------------------------------------------------------------
def _vmem_capacity_bytes():
    try:
        info = pltpu.get_tpu_info()
        cap = int(getattr(info, "vmem_capacity_bytes", 0) or 0)
        if cap > 0:
            return cap
    except Exception:
        pass
    return 64 * 1024 * 1024  # conservative fallback: v7x per-TensorCore VMEM


def feed_forward(x, w1, b1, w2, b2, *, tm=None, tf=1024,
                 matmul_dtype=jnp.bfloat16, weight_buffers=None):
    """x: (..., d_model) -> (..., d_model). Fused FFN in a single Pallas kernel.

    tm: row tile (tokens per MXU pass). None -> generation-aware default
        (512 on 128-MiB-VMEM chips, 256 on 64-MiB-VMEM chips), clamped to the
        padded row count and shrunk to keep >= 2 row tiles for megacore.
    tf: target d_ff tile (lane-aligned). d_ff is zero-padded when ragged.
    matmul_dtype: MXU operand dtype (default bf16). f32 accumulation/bias/ReLU
        and the caller-visible output dtype (= x.dtype) are preserved.
        Pass None to keep operands in the input dtype.
    weight_buffers: optional pipeline depth (e.g. 3) for the W1/W2 streams.
    """
    orig_shape = x.shape
    out_dtype = x.dtype
    d_model = orig_shape[-1]
    d_ff = w1.shape[1]

    compute_dtype = jnp.dtype(matmul_dtype) if matmul_dtype is not None else jnp.dtype(x.dtype)

    # One-time boundary casts (review: hoist the x cast out of the kernel).
    if w1.dtype != compute_dtype:
        w1 = w1.astype(compute_dtype)
    if w2.dtype != compute_dtype:
        w2 = w2.astype(compute_dtype)

    x2d = x.reshape(-1, d_model)
    if x2d.dtype != compute_dtype:
        x2d = x2d.astype(compute_dtype)
    n = x2d.shape[0]

    # dtype-dependent minimum sublane tile: f32 -> 8, bf16 -> 16, int8/fp8 -> 32
    min_itemsize = min(jnp.dtype(compute_dtype).itemsize, jnp.dtype(out_dtype).itemsize)
    min_rows = {4: 8, 2: 16, 1: 32}[min_itemsize]

    vmem_cap = _vmem_capacity_bytes()

    # --- row tile (generation aware) + megacore occupancy + tail padding ----
    if tm is None:
        tm = 256 if vmem_cap <= 64 * 1024 * 1024 else 512
    tm = max(min_rows, min(int(tm), _round_up(n, min_rows)))
    tm = _round_up(tm, min_rows)
    # Keep >= 2 row tiles when there are enough rows (both TCs on v7x busy).
    if n > min_rows:
        while tm > min_rows and _cdiv(n, tm) < 2:
            new_tm = _round_up(max(min_rows, tm // 2), min_rows)
            if new_tm == tm:
                break
            tm = new_tm
    n_pad = _round_up(n, tm)
    if n_pad != n:
        x2d = jnp.pad(x2d, ((0, n_pad - n), (0, 0)))

    # --- d_ff tile: lane-aligned; pad d_ff (zeros) instead of whole-weight loads
    tf = int(tf)
    if d_ff <= tf:
        tf = d_ff
        d_ff_pad = d_ff
    else:
        tf = max(128, (tf // 128) * 128)
        if d_ff % tf == 0:
            d_ff_pad = d_ff
        else:
            best = 0
            cand = (tf // 256) * 256
            while cand >= 256:
                if d_ff % cand == 0:
                    best = cand
                    break
                cand -= 256
            if best:
                tf = best
                d_ff_pad = d_ff
            else:
                d_ff_pad = _round_up(d_ff, tf)

    if d_ff_pad != d_ff:
        # Zero-padded W1 columns / b1 entries / W2 rows contribute exactly 0.
        w1 = jnp.pad(w1, ((0, 0), (0, d_ff_pad - d_ff)))
        b1 = jnp.pad(b1, ((0, d_ff_pad - d_ff),))
        w2 = jnp.pad(w2, ((0, d_ff_pad - d_ff), (0, 0)))

    b1_2d = b1.reshape(1, d_ff_pad)
    b2_2d = b2.reshape(1, d_model)

    grid = (n_pad // tm, d_ff_pad // tf)

    # f32 output -> accumulate directly into o_ref; narrow output -> f32 scratch.
    use_scratch = jnp.dtype(out_dtype) != jnp.dtype(jnp.float32)
    kernel = _ffn_kernel_scratch if use_scratch else _ffn_kernel_f32_out
    scratch_shapes = [pltpu.VMEM((tm, d_model), jnp.float32)] if use_scratch else []

    # --- weight block specs (optionally deeper-buffered) ---------------------
    if weight_buffers is not None:
        w1_spec = pl.BlockSpec((d_model, tf), lambda i, j: (0, j),
                               pipeline_mode=pl.Buffered(int(weight_buffers)))
        w2_spec = pl.BlockSpec((tf, d_model), lambda i, j: (j, 0),
                               pipeline_mode=pl.Buffered(int(weight_buffers)))
        n_w_bufs = int(weight_buffers)
    else:
        w1_spec = pl.BlockSpec((d_model, tf), lambda i, j: (0, j))
        w2_spec = pl.BlockSpec((tf, d_model), lambda i, j: (j, 0))
        n_w_bufs = 2

    # --- VMEM budget (capped at ~85% of physical capacity) ------------------
    x_bytes = jnp.dtype(compute_dtype).itemsize
    w_bytes = jnp.dtype(w1.dtype).itemsize
    o_bytes = jnp.dtype(out_dtype).itemsize
    b_bytes = jnp.dtype(b1.dtype).itemsize
    est = (2 * tm * d_model * x_bytes                     # x tile (2-buf)
           + 2 * tm * d_model * o_bytes                   # out tile (2-buf)
           + n_w_bufs * d_model * tf * w_bytes            # W1 blocks
           + n_w_bufs * tf * d_model * w_bytes            # W2 blocks
           + 2 * 8 * (_round_up(tf, 128) + _round_up(d_model, 128)) * b_bytes
           + (tm * d_model * 4 if use_scratch else 0)     # f32 accumulator
           + tm * tf * 4)                                 # h intermediate
    vmem_limit = min(int(vmem_cap * 0.85),
                     max(32 * 1024 * 1024, int(est * 1.3)))

    # --- cost estimate (weights are re-streamed once per row tile) ----------
    num_row_tiles = n_pad // tm
    flops = 4 * n_pad * d_model * d_ff_pad
    bytes_accessed = (n_pad * d_model * (x_bytes + o_bytes)
                      + num_row_tiles * (2 * d_model * d_ff_pad * w_bytes
                                         + (d_ff_pad + d_model) * b_bytes))

    out = pl.pallas_call(
        kernel,
        out_shape=jax.ShapeDtypeStruct((n_pad, d_model), out_dtype),
        grid_spec=pltpu.PrefetchScalarGridSpec(
            num_scalar_prefetch=0,
            grid=grid,
            in_specs=[
                pl.BlockSpec((tm, d_model), lambda i, j: (i, 0)),   # x tile
                w1_spec,                                            # W1 block
                pl.BlockSpec((1, tf), lambda i, j: (0, j)),         # b1 slice
                w2_spec,                                            # W2 block
                pl.BlockSpec((1, d_model), lambda i, j: (0, 0)),    # b2 (constant)
            ],
            out_specs=pl.BlockSpec((tm, d_model), lambda i, j: (i, 0)),
            scratch_shapes=scratch_shapes,
        ),
        compiler_params=pltpu.CompilerParams(
            dimension_semantics=("parallel", "arbitrary"),
            vmem_limit_bytes=vmem_limit),
        cost_estimate=pl.CostEstimate(flops=flops, transcendentals=0,
                                      bytes_accessed=bytes_accessed),
    )(x2d, w1, b1_2d, w2, b2_2d)

    if n_pad != n:
        out = out[:n]
    return out.reshape(orig_shape)


def init_feed_forward_params(key, d_model, d_ff, dtype=jnp.float32):
    """Deterministic init mimicking nn.Linear default (uniform +-1/sqrt(fan_in)).
    Weights are returned pre-transposed: W1 (d_model, d_ff), W2 (d_ff, d_model)."""
    k1, k2, k3, k4 = jax.random.split(key, 4)
    lim1 = 1.0 / math.sqrt(d_model)
    lim2 = 1.0 / math.sqrt(d_ff)
    w1 = jax.random.uniform(k1, (d_model, d_ff), dtype, -lim1, lim1)
    b1 = jax.random.uniform(k2, (d_ff,), dtype, -lim1, lim1)
    w2 = jax.random.uniform(k3, (d_ff, d_model), dtype, -lim2, lim2)
    b2 = jax.random.uniform(k4, (d_model,), dtype, -lim2, lim2)
    return w1, b1, w2, b2


if __name__ == "__main__":
    key = jax.random.PRNGKey(0)

    # --- case 1: small shapes from the module spec ---------------------------
    batch, seq, d_model, d_ff = 2, 8, 32, 64
    kx, kp = jax.random.split(key)
    x = jax.random.normal(kx, (batch, seq, d_model), jnp.float32)
    w1, b1, w2, b2 = init_feed_forward_params(kp, d_model, d_ff)
    ref = jnp.maximum(x @ w1 + b1, 0.0) @ w2 + b2

    # Default path: bf16 MXU operands, f32 accumulation, f32 output (no scratch).
    out = jax.block_until_ready(feed_forward(x, w1, b1, w2, b2))
    assert out.shape == (batch, seq, d_model)
    assert jnp.allclose(out, ref, atol=2e-2, rtol=2e-2)

    # Full-f32 operand path (tighter numerical check).
    out_f32 = jax.block_until_ready(feed_forward(x, w1, b1, w2, b2, matmul_dtype=None))
    assert jnp.allclose(out_f32, ref, atol=1e-4, rtol=1e-4)

    # bf16 input/output path (exercises the f32-scratch accumulator variant).
    out_bf16 = jax.block_until_ready(feed_forward(x.astype(jnp.bfloat16), w1, b1, w2, b2))
    assert out_bf16.dtype == jnp.bfloat16
    assert jnp.allclose(out_bf16.astype(jnp.float32), ref, atol=5e-2, rtol=5e-2)

    # --- case 2: multi-step d_ff reduction + >= 2 row tiles ------------------
    d_model2, d_ff2, n2 = 128, 512, 128
    k1, k2 = jax.random.split(kp)
    x2 = jax.random.normal(k1, (n2, d_model2), jnp.float32)
    p2 = init_feed_forward_params(k2, d_model2, d_ff2)
    ref2 = jnp.maximum(x2 @ p2[0] + p2[1], 0.0) @ p2[2] + p2[3]
    out2 = jax.block_until_ready(feed_forward(x2, *p2, tm=64, tf=256))
    assert jnp.allclose(out2, ref2, atol=5e-2, rtol=5e-2)

    print("KERNEL_OK")
</pallas_src>

<mosaic_0001>
module attributes {stable_mosaic.version = 11 : i64} {
  func.func @_ffn_kernel_f32_out(%arg0: i32, %arg1: i32, %arg2: memref<16x32xbf16, #tpu.memory_space<vmem>>, %arg3: memref<32x64xbf16, #tpu.memory_space<vmem>>, %arg4: memref<1x64xf32, #tpu.memory_space<vmem>>, %arg5: memref<64x32xbf16, #tpu.memory_space<vmem>>, %arg6: memref<1x32xf32, #tpu.memory_space<vmem>>, %arg7: memref<16x32xf32, #tpu.memory_space<vmem>>) attributes {dimension_semantics = [#tpu.dimension_semantics<parallel>, #tpu.dimension_semantics<arbitrary>], iteration_bounds = array<i64: 1, 1>, scalar_prefetch = 0 : i64, scratch_operands = 0 : i64, tpu.core_type = #tpu.core_type<tc>, window_params = [{transform_indices = @transform_0, window_bounds = array<i64: 16, 32>}, {transform_indices = @transform_1, window_bounds = array<i64: 32, 64>}, {transform_indices = @transform_2, window_bounds = array<i64: 1, 64>}, {transform_indices = @transform_3, window_bounds = array<i64: 64, 32>}, {pipeline_mode = #tpu.pipeline_mode<synchronous>, transform_indices = @transform_4, window_bounds = array<i64: 1, 32>}, {transform_indices = @transform_5, window_bounds = array<i64: 16, 32>}]} {
    %c0_i32 = arith.constant 0 : i32
    %0 = arith.cmpi eq, %arg1, %c0_i32 : i32
    %1 = arith.extui %0 : i1 to i32
    %c0_i32_0 = arith.constant 0 : i32
    %2 = arith.cmpi ne, %1, %c0_i32_0 : i32
    scf.if %2 {
      %cst_16 = arith.constant 0.000000e+00 : f32
      %20 = vector.broadcast %cst_16 : f32 to vector<16x32xf32>
      %c0_17 = arith.constant 0 : index
      %c0_18 = arith.constant 0 : index
      %21 = vector.load %arg7[%c0_17, %c0_18] : memref<16x32xf32, #tpu.memory_space<vmem>>, vector<16x32xf32>
      tpu.vector_store %arg7[%c0_17, %c0_18], %20 {strides = array<i32>} : memref<16x32xf32, #tpu.memory_space<vmem>>, vector<16x32xf32>,
    } else {
    }
    %c0 = arith.constant 0 : index
    %c0_1 = arith.constant 0 : index
    %3 = vector.load %arg2[%c0, %c0_1] : memref<16x32xbf16, #tpu.memory_space<vmem>>, vector<16x32xbf16>
    %c0_2 = arith.constant 0 : index
    %c0_3 = arith.constant 0 : index
    %4 = vector.load %arg3[%c0_2, %c0_3] : memref<32x64xbf16, #tpu.memory_space<vmem>>, vector<32x64xbf16>
    %cst = arith.constant dense<0.000000e+00> : vector<16x64xf32>
    %5 = tpu.matmul %3, %4, %cst {dimension_numbers = #tpu.dot_dimension_numbers<[1], [0], [0], [1], [0, 0, 1, 1], [], []>} : vector<16x32xbf16>, vector<32x64xbf16>, vector<16x64xf32> -> vector<16x64xf32>
    %c0_4 = arith.constant 0 : index
    %c0_5 = arith.constant 0 : index
    %6 = vector.load %arg4[%c0_4, %c0_5] : memref<1x64xf32, #tpu.memory_space<vmem>>, vector<1x64xf32>
    %7 = vector.broadcast %6 : vector<1x64xf32> to vector<16x64xf32>
    %8 = arith.addf %5, %7 : vector<16x64xf32>
    %cst_6 = arith.constant 0.000000e+00 : f32
    %9 = vector.broadcast %cst_6 : f32 to vector<16x64xf32>
    %10 = arith.maximumf %8, %9 : vector<16x64xf32>
    %c0_7 = arith.constant 0 : index
    %c0_8 = arith.constant 0 : index
    %11 = vector.load %arg7[%c0_7, %c0_8] : memref<16x32xf32, #tpu.memory_space<vmem>>, vector<16x32xf32>
    %12 = arith.truncf %10 : vector<16x64xf32> to vector<16x64xbf16>
    %c0_9 = arith.constant 0 : index
    %c0_10 = arith.constant 0 : index
    %13 = vector.load %arg5[%c0_9, %c0_10] : memref<64x32xbf16, #tpu.memory_space<vmem>>, vector<64x32xbf16>
    %cst_11 = arith.constant dense<0.000000e+00> : vector<16x32xf32>
    %14 = tpu.matmul %12, %13, %cst_11 {dimension_numbers = #tpu.dot_dimension_numbers<[1], [0], [0], [1], [0, 0, 1, 1], [], []>} : vector<16x64xbf16>, vector<64x32xbf16>, vector<16x32xf32> -> vector<16x32xf32>
    %15 = arith.addf %11, %14 : vector<16x32xf32>
    %c0_12 = arith.constant 0 : index
    %c0_13 = arith.constant 0 : index
    %16 = vector.load %arg7[%c0_12, %c0_13] : memref<16x32xf32, #tpu.memory_space<vmem>>, vector<16x32xf32>
    tpu.vector_store %arg7[%c0_12, %c0_13], %15 {strides = array<i32>} : memref<16x32xf32, #tpu.memory_space<vmem>>, vector<16x32xf32>,
    %c0_i32_14 = arith.constant 0 : i32
    %17 = arith.cmpi eq, %arg1, %c0_i32_14 : i32
    %18 = arith.extui %17 : i1 to i32
    %c0_i32_15 = arith.constant 0 : i32
    %19 = arith.cmpi ne, %18, %c0_i32_15 : i32
    scf.if %19 {
      %c0_16 = arith.constant 0 : index
      %c0_17 = arith.constant 0 : index
      %20 = vector.load %arg7[%c0_16, %c0_17] : memref<16x32xf32, #tpu.memory_space<vmem>>, vector<16x32xf32>
      %c0_18 = arith.constant 0 : index
      %c0_19 = arith.constant 0 : index
      %21 = vector.load %arg6[%c0_18, %c0_19] : memref<1x32xf32, #tpu.memory_space<vmem>>, vector<1x32xf32>
      %22 = vector.broadcast %21 : vector<1x32xf32> to vector<16x32xf32>
      %23 = arith.addf %20, %22 : vector<16x32xf32>
      %c0_20 = arith.constant 0 : index
      %c0_21 = arith.constant 0 : index
      %24 = vector.load %arg7[%c0_20, %c0_21] : memref<16x32xf32, #tpu.memory_space<vmem>>, vector<16x32xf32>
      tpu.vector_store %arg7[%c0_20, %c0_21], %23 {strides = array<i32>} : memref<16x32xf32, #tpu.memory_space<vmem>>, vector<16x32xf32>,
    } else {
    }
    return
  }
  func.func @transform_0(%arg0: i32, %arg1: i32) -> (i32, i32) {
    %c0_i32 = arith.constant 0 : i32
    %c0_i32_0 = arith.constant 0 : i32
    return %arg0, %c0_i32 : i32, i32
  }
  func.func @transform_1(%arg0: i32, %arg1: i32) -> (i32, i32) {
    %c0_i32 = arith.constant 0 : i32
    %c0_i32_0 = arith.constant 0 : i32
    return %c0_i32, %arg1 : i32, i32
  }
  func.func @transform_2(%arg0: i32, %arg1: i32) -> (i32, i32) {
    %c0_i32 = arith.constant 0 : i32
    %c0_i32_0 = arith.constant 0 : i32
    return %c0_i32, %arg1 : i32, i32
  }
  func.func @transform_3(%arg0: i32, %arg1: i32) -> (i32, i32) {
    %c0_i32 = arith.constant 0 : i32
    %c0_i32_0 = arith.constant 0 : i32
    return %arg1, %c0_i32 : i32, i32
  }
  func.func @transform_4(%arg0: i32, %arg1: i32) -> (i32, i32) {
    %c0_i32 = arith.constant 0 : i32
    %c0_i32_0 = arith.constant 0 : i32
    %c0_i32_1 = arith.constant 0 : i32
    return %c0_i32, %c0_i32_0 : i32, i32
  }
  func.func @transform_5(%arg0: i32, %arg1: i32) -> (i32, i32) {
    %c0_i32 = arith.constant 0 : i32
    %c0_i32_0 = arith.constant 0 : i32
    return %arg0, %c0_i32 : i32, i32
  }
}

</mosaic_0001>

<bundles_post_ra>
// kernel: tpu_custom_call.1
= control target key start
LH: loop header
LB: loop body
LE: loop exit
PB: predicated region body
PF: predicated region fallthrough
CT: control target
= control target key end

     0   :  { %v297_v1 = vmov 0.0   ;;  %vm298_vm0 = vmmov 0   ;;  %vm26_vm1 = vcmask 261120   ;;  %s378_s0 = inlined_call_operand.vmem [shape: bf16[16,32], index: 0, kind: input, shape index: {}]   ;;  %s379_s1 = inlined_call_operand.vmem [shape: bf16[32,64], index: 1, kind: input, shape index: {}]   ;;  %s380_s2 = inlined_call_operand.vmem [shape: f32[1,64], index: 2, kind: input, shape index: {}]   ;;  %s381_s3 = inlined_call_operand.vmem [shape: bf16[64,32], index: 3, kind: input, shape index: {}]   ;;  %s382_s4 = inlined_call_operand.vmem [shape: f32[1,32], index: 4, kind: input, shape index: {}]   ;;  %s383_s5 = inlined_call_operand.hbm [shape: f32[16,32], index: 5, kind: output, shape index: {}]  }
   0x1   :  { %v266_v0 = vld [vmem:[%s379_s1] sm:$0xff]   ;;  %241 = vmatprep.subr.bf16.mxu0 %v297_v1  ;;  %249 = vmatprep.subr.bf16.mxu1 %v297_v1  ;;  %v267_v2 = vld [vmem:[%s379_s1 + $0x8] sm:$0xff]   ;;  %27 = vst.msk [vmem:[#allocation2] sm:$0xff] %vm26_vm1, %v297_v1  ;;  %28 = vst.msk [vmem:[#allocation2 + $0x8] sm:$0xff] %vm26_vm1, %v297_v1 }
   0x2   :  { %242 = vmatpush3.bf16.msra.mxu0 %v266_v0  ;;  %245 = vmatprep.mubr.msk.bf16.mxu0 %vm298_vm0, %v297_v1  ;;  %v269_v3 = vld [vmem:[%s381_s3] sm:$0xff]   ;;  %v270_v5 = vld [vmem:[%s381_s3 + $0x8] sm:$0xff]  }
   0x3   :  { %243 = vmatprep.subr.bf16.mxu0 %v297_v1  ;;  %257 = vmatprep.mubr.msk.bf16.mxu1 %vm298_vm0, %v297_v1  ;;  %v268_v4 = vld [vmem:[%s378_s0] sm:$0xff]  }
   0x4   :  { %250 = vmatpush3.bf16.msra.mxu1 %v269_v3 }
   0x5   :  { %251 = vmatprep.subr.bf16.mxu1 %v297_v1 }
   0x6   :  { %244 = vmatpush3.bf16.msra.mxu0 %v267_v2 }
   0x7   :  { %10 = vsyncpa [#allocation3], 0  ;;  %v271_v6 = vld [vmem:[%s381_s3 + $0x10] sm:$0xff]   ;;  %v272_v7 = vld [vmem:[%s381_s3 + $0x18] sm:$0xff]   ;;  %vm141_vm2 = vcmask 523264   ;;  %s299_s7 = smov [#allocation2]  }
   0x8   :  { %252 = vmatpush3.bf16.msra.mxu1 %v270_v5  ;;  %v222_v8 = vld [vmem:[%s380_s2] ss:$0 sm:$0xff]  ;;  %v107_v20 = vld [vmem:[#allocation2 + $0x8] sm:$0xff]  ;;  %s211_s8 = sshll.u32 %s299_s7, 4  ;;  %s212_s8 = int_to_ptr.vmem [resolvable:$true] %s211_s8 }
   0x9   :  { %246 = vmatmul.mubr.msk.bf16.vlgmr.msra.gmra.mrb[0].mxu0 %vm26_vm1, %v268_v4  ;;  %253 = vmatprep.subr.bf16.mxu1 %v297_v1  ;;  %v106_v18 = vld [vmem:[#allocation2] sm:$0xff]  ;;  %s273_s9 = scalar_lea.vmem %s212_s8, 256  ;;  %p278_p1 = scmp.lt.s32.totalorder %s212_s8, %s212_s8 }
   0xa   :  { %v232_v26 = vld [vmem:[%s382_s4] ss:$0 sm:$0xff]  ;;  %p274_p0 = scmp.ne.s32.totalorder %s212_s8, %s273_s9  ;;  %p279_p2 = scmp.lt.s32.totalorder %s273_s9, %s273_s9 }
   0xc   :  { %254 = vmatpush3.bf16.msra.mxu1 %v271_v6  ;;  %p280_p3 = por %p279_p2, %p278_p1 }
   0xd   :  { %255 = vmatprep.subr.bf16.mxu1 %v297_v1 }
   0xe   :  { %p281_p4 = pnand %p280_p3, %p274_p0 }
  0x10   :  { %256 = vmatpush3.bf16.msra.mxu1 %v272_v7 }
  0xdc   :  { %v97_v9 = vpop.f32.mrb[0].mxu0 }
  0xdd   :  { %v98_v10 = vadd.f32 %v222_v8, %v97_v9  ;;  %v247_v11 = vpop.f32.mrb[1].mxu0 }
  0xde   :  { %v100_v12 = vpop.f32.mrb[2].mxu0 }
  0xdf   :  { %v101_v13 = vadd.f32 %v222_v8, %v100_v12  ;;  %v248_v14 = vpop.f32.mrb[3].mxu0  ;;  %v104_v15 = vmax.f32 %v98_v10, 0.0 }
  0xe1   :  { %v105_v16 = vmax.f32 %v101_v13, 0.0 }
  0xe3   :  { %v108_v17 = vpack.c.bf16 %v105_v16, %v104_v15 }
  0xe5   :  { %258 = vmatmul.mubr.msk.bf16.vlgmr.msra.gmra.mrb[0].mxu1 %vm141_vm2, %v108_v17 }
 0x1b8   :  { %v179_v19 = vpop.f32.mrb[0].mxu1 }
 0x1b9   :  { %v186_v21 = vadd.f32 %v179_v19, %v106_v18  ;;  %v259_v22 = vpop.f32.mrb[1].mxu1 }
 0x1ba   :  { %v182_v23 = vpop.f32.mrb[2].mxu1 }
 0x1bb   :  { %188 = vst.msk [vmem:[#allocation2] sm:$0xff] %vm26_vm1, %v186_v21  ;;  %v187_v24 = vadd.f32 %v182_v23, %v107_v20  ;;  %v260_v25 = vpop.f32.mrb[3].mxu1 }
 0x1bd   :  { %189 = vst.msk [vmem:[#allocation2 + $0x8] sm:$0xff] %vm26_vm1, %v187_v24 }
 0x1c2   :  { %v193_v27 = vld [vmem:[#allocation2] sm:$0xff] }
 0x1c3   :  { %v202_v28 = vadd.f32 %v232_v26, %v193_v27 }
 0x1c4   :  { %v194_v29 = vld [vmem:[#allocation2 + $0x8] sm:$0xff] }
 0x1c5   :  { %v203_v30 = vadd.f32 %v232_v26, %v194_v29  ;;  %204 = vst.msk [vmem:[#allocation2] sm:$0xff] %vm26_vm1, %v202_v28 }
 0x1c7   :  { %205 = vst.msk [vmem:[#allocation2 + $0x8] sm:$0xff] %vm26_vm1, %v203_v30 }
 0x1c8   :  { %284 = shalt.err (!%p281_p4)
}
 0x1c9   :  { %s285_s11 = scalar_lea.hbm %s383_s5, 256 }
 0x1ca   :  { %p286_p5 = scmp.ne.s32.totalorder %s383_s5, %s285_s11  ;;  %p289_p6 = scmp.lt.u32.totalorder %s285_s11, %s383_s5 }
 0x1cc   :  { %p291_p7 = pnand %p289_p6, %p286_p5 }
 0x1ce   :  { %294 = shalt.err (!%p291_p7)
}
 0x1cf   :  { %s300_s16 = smov 128   ;;  %s301_s17 = smov 8  }
 0x1d0   :  { %217 = dma.vmem_to_hbm [thread:$0]  %s212_s8, 256, %s383_s5, [#allocation3], %s300_s16, %s300_s16, %s301_s17  }
 0x1d1   :  { %295 = dma.done.wait [#allocation3], 256  }
 0x1d2   :  { %296 = vsyncadd [#allocation3], 4294967040 }
 0x1d3   :  { %221 = vsyncpa [#allocation3], 1 }

</bundles_post_ra>
